<compile_context>
chip_gen: v5e
topology: v5e:2x2
jax: 0.10.0
libtpu: 0.0.40
codegen_flags: <defaults>
</compile_context>

<pallas_src>
import jax
import jax.numpy as jnp
from jax import lax
from jax.experimental import pallas as pl
from jax.experimental.pallas import tpu as pltpu

MAX_CNT = 100000.0


def _make_kernel(unbiased: bool, affine: bool):
    bias_correction = 1.0 if unbiased else 0.0

    def kernel(x_ref, m_ref, *rest):
        if affine:
            g_ref, b_ref, o_ref = rest
        else:
            (o_ref,) = rest

        x = x_ref[...].astype(jnp.float32)   # (1, C_TILE, T_pad)
        m = m_ref[...].astype(jnp.float32)   # (1, 1,      T_pad)

        # Per-batch valid count (padded lanes are masked out, contribute 0).
        cnt = jnp.sum(m, axis=-1, keepdims=True)                       # (1,1,1)
        inv_cnt_mu = 1.0 / jnp.clip(cnt, 1.0, MAX_CNT)
        inv_cnt_sig = 1.0 / jnp.clip(cnt - bias_correction, 1.0, MAX_CNT)

        # Single pass over the x tile: masked product reused for both sums.
        xm = x * m                                                     # (1,C,T)
        s1 = jnp.sum(xm, axis=-1, keepdims=True)                       # (1,C,1)
        s2 = jnp.sum(xm * x, axis=-1, keepdims=True)                   # (1,C,1)

        mu = s1 * inv_cnt_mu
        # sum((x-mu)^2 * m) == s2 - mu*s1  (exact in real arithmetic); clamp >= 0
        # to guard against f32 cancellation before rsqrt.
        var = jnp.maximum((s2 - mu * s1) * inv_cnt_sig, 0.0)
        inv_sigma = lax.rsqrt(var + 1e-08)                             # (1,C,1)

        # Fuse normalize + affine into per-channel scale/shift.
        if affine:
            scale = g_ref[...].astype(jnp.float32) * inv_sigma
            shift = b_ref[...].astype(jnp.float32) - mu * scale
        else:
            scale = inv_sigma
            shift = -mu * scale

        o_ref[...] = (x * scale + shift).astype(o_ref.dtype)

    return kernel


def _choose_c_tile(C: int, T_pad: int, itemsize: int,
                   target_bytes: int = 4 << 20) -> int:
    """Largest multiple-of-8 divisor of C whose (C_TILE, T_pad) block fits the budget."""
    if C % 8 != 0:
        # Block second-to-last dim must equal the full C dim in this case.
        return C
    divisors = [d for d in range(8, C + 1, 8) if C % d == 0]
    fitting = [d for d in divisors if d * T_pad * itemsize <= target_bytes]
    if fitting:
        return max(fitting)
    return min(divisors)
    # TODO(synk): for extremely long T where even (8, T_pad) exceeds VMEM budget,
    # switch to a T-reduction grid axis with scratch accumulators.


def masked_instance_norm_1d(x, x_mask, gamma=None, beta=None, *,
                            unbiased=True, affine=False):
    """x: [B, C, T] float, x_mask: [B, T] (bool or float), gamma/beta: [C] (if affine)."""
    B, C, T = x.shape
    T_pad = ((T + 127) // 128) * 128

    mask = x_mask.astype(x.dtype)
    if T_pad != T:
        x_p = jnp.pad(x, ((0, 0), (0, 0), (0, T_pad - T)))
        mask = jnp.pad(mask, ((0, 0), (0, T_pad - T)))
    else:
        x_p = x
    mask3 = mask.reshape(B, 1, T_pad)

    C_TILE = _choose_c_tile(C, T_pad, x.dtype.itemsize)
    grid = (B, C // C_TILE)

    in_specs = [
        pl.BlockSpec((1, C_TILE, T_pad), lambda b, c: (b, c, 0)),  # x
        pl.BlockSpec((1, 1, T_pad), lambda b, c: (b, 0, 0)),       # mask
    ]
    args = [x_p, mask3]
    if affine:
        in_specs += [
            pl.BlockSpec((1, C_TILE, 1), lambda b, c: (0, c, 0)),  # gamma (f32)
            pl.BlockSpec((1, C_TILE, 1), lambda b, c: (0, c, 0)),  # beta  (f32)
        ]
        args += [
            jnp.asarray(gamma, jnp.float32).reshape(1, C, 1),
            jnp.asarray(beta, jnp.float32).reshape(1, C, 1),
        ]

    kernel = _make_kernel(unbiased, affine)

    y = pl.pallas_call(
        kernel,
        out_shape=jax.ShapeDtypeStruct((B, C, T_pad), x.dtype),
        grid_spec=pltpu.PrefetchScalarGridSpec(
            num_scalar_prefetch=0,
            grid=grid,
            in_specs=in_specs,
            out_specs=pl.BlockSpec((1, C_TILE, T_pad), lambda b, c: (b, c, 0)),
        ),
        compiler_params=pltpu.CompilerParams(
            dimension_semantics=("parallel", "parallel"),
            # Safe on every generation (v5e default scoped VMEM is only 16 MiB;
            # v7x physical is 64 MiB so we do not request more than 32 MiB).
            vmem_limit_bytes=32 * 1024 * 1024,
        ),
    )(*args)

    if T_pad != T:
        y = y[:, :, :T]
    return y


def masked_instance_norm_1d_ref(x, x_mask, gamma=None, beta=None, *,
                                unbiased=True, affine=False):
    """Pure-JAX reference mirroring the PyTorch forward (two-pass formulation)."""
    m = x_mask.astype(x.dtype)[:, None, :]
    cnt = jnp.sum(m, axis=-1, keepdims=True)
    cnt_for_mu = jnp.clip(cnt, 1.0, MAX_CNT)
    mu = jnp.sum(x * m, axis=-1, keepdims=True) / cnt_for_mu
    sigma = (x - mu) ** 2
    cnt_for_sigma = jnp.clip(cnt - (1.0 if unbiased else 0.0), 1.0, MAX_CNT)
    sigma = jnp.sum(sigma * m, axis=-1, keepdims=True) / cnt_for_sigma
    sigma = jnp.sqrt(sigma + 1e-08)
    y = (x - mu) / sigma
    if affine:
        y = y * gamma[None, :, None] + beta[None, :, None]
    return y


if __name__ == "__main__":
    B, C, T = 2, 4, 16
    unbiased = True

    key = jax.random.PRNGKey(0)
    kx, km = jax.random.split(key)
    x = jax.random.normal(kx, (B, C, T), dtype=jnp.float32)

    # Valid-length mask: first L_b positions are 1, rest 0.
    lengths = jnp.array([12, 7], dtype=jnp.int32)
    x_mask = jnp.arange(T)[None, :] < lengths[:, None]  # [B, T] bool

    # Deterministic parameter init (as in __init__): gamma = ones, beta = zeros.
    gamma = jnp.ones((C,), dtype=jnp.float32)
    beta = jnp.zeros((C,), dtype=jnp.float32)

    ok = True
    for affine in (True, False):
        y = masked_instance_norm_1d(x, x_mask, gamma, beta,
                                    unbiased=unbiased, affine=affine)
        y = jax.block_until_ready(y)
        y_ref = masked_instance_norm_1d_ref(x, x_mask, gamma, beta,
                                            unbiased=unbiased, affine=affine)
        assert y.shape == (B, C, T)
        assert jnp.allclose(y, y_ref, atol=1e-5, rtol=1e-5), \
            f"mismatch vs reference (affine={affine})"

    print("KERNEL_OK")
</pallas_src>

<mosaic_0001>
module attributes {stable_mosaic.version = 11 : i64} {
  func.func @kernel(%arg0: i32, %arg1: i32, %arg2: memref<1x4x128xf32, #tpu.memory_space<vmem>>, %arg3: memref<1x1x128xf32, #tpu.memory_space<vmem>>, %arg4: memref<1x4x1xf32, #tpu.memory_space<vmem>>, %arg5: memref<1x4x1xf32, #tpu.memory_space<vmem>>, %arg6: memref<1x4x128xf32, #tpu.memory_space<vmem>>) attributes {dimension_semantics = [#tpu.dimension_semantics<parallel>, #tpu.dimension_semantics<parallel>], iteration_bounds = array<i64: 2, 1>, scalar_prefetch = 0 : i64, scratch_operands = 0 : i64, tpu.core_type = #tpu.core_type<tc>, window_params = [{transform_indices = @transform_0, window_bounds = array<i64: 1, 4, 128>}, {transform_indices = @transform_1, window_bounds = array<i64: 1, 1, 128>}, {transform_indices = @transform_2, window_bounds = array<i64: 1, 4, 1>}, {transform_indices = @transform_3, window_bounds = array<i64: 1, 4, 1>}, {transform_indices = @transform_4, window_bounds = array<i64: 1, 4, 128>}]} {
    %c0 = arith.constant 0 : index
    %c0_0 = arith.constant 0 : index
    %c0_1 = arith.constant 0 : index
    %0 = vector.load %arg2[%c0, %c0_0, %c0_1] : memref<1x4x128xf32, #tpu.memory_space<vmem>>, vector<1x4x128xf32>
    %c0_2 = arith.constant 0 : index
    %c0_3 = arith.constant 0 : index
    %c0_4 = arith.constant 0 : index
    %1 = vector.load %arg3[%c0_2, %c0_3, %c0_4] : memref<1x1x128xf32, #tpu.memory_space<vmem>>, vector<1x1x128xf32>
    %cst = arith.constant dense<0.000000e+00> : vector<1x1xf32>
    %2 = vector.multi_reduction <add>, %1, %cst [2] : vector<1x1x128xf32> to vector<1x1xf32>
    %3 = vector.shape_cast %2 : vector<1x1xf32> to vector<1x1x1xf32>
    %cst_5 = arith.constant 1.000000e+00 : f32
    %cst_6 = arith.constant 1.000000e+05 : f32
    %4 = vector.broadcast %cst_5 : f32 to vector<1x1x1xf32>
    %5 = arith.maximumf %4, %3 : vector<1x1x1xf32>
    %6 = vector.broadcast %cst_6 : f32 to vector<1x1x1xf32>
    %7 = arith.minimumf %6, %5 : vector<1x1x1xf32>
    %cst_7 = arith.constant 1.000000e+00 : f32
    %8 = vector.broadcast %cst_7 : f32 to vector<1x1x1xf32>
    %9 = arith.divf %8, %7 : vector<1x1x1xf32>
    %cst_8 = arith.constant 1.000000e+00 : f32
    %10 = vector.broadcast %cst_8 : f32 to vector<1x1x1xf32>
    %11 = arith.subf %3, %10 : vector<1x1x1xf32>
    %cst_9 = arith.constant 1.000000e+00 : f32
    %cst_10 = arith.constant 1.000000e+05 : f32
    %12 = vector.broadcast %cst_9 : f32 to vector<1x1x1xf32>
    %13 = arith.maximumf %12, %11 : vector<1x1x1xf32>
    %14 = vector.broadcast %cst_10 : f32 to vector<1x1x1xf32>
    %15 = arith.minimumf %14, %13 : vector<1x1x1xf32>
    %cst_11 = arith.constant 1.000000e+00 : f32
    %16 = vector.broadcast %cst_11 : f32 to vector<1x1x1xf32>
    %17 = arith.divf %16, %15 : vector<1x1x1xf32>
    %18 = vector.broadcast %1 : vector<1x1x128xf32> to vector<1x4x128xf32>
    %19 = arith.mulf %0, %18 : vector<1x4x128xf32>
    %cst_12 = arith.constant dense<0.000000e+00> : vector<1x4xf32>
    %20 = vector.multi_reduction <add>, %19, %cst_12 [2] : vector<1x4x128xf32> to vector<1x4xf32>
    %21 = vector.shape_cast %20 : vector<1x4xf32> to vector<1x4x1xf32>
    %22 = arith.mulf %19, %0 : vector<1x4x128xf32>
    %cst_13 = arith.constant dense<0.000000e+00> : vector<1x4xf32>
    %23 = vector.multi_reduction <add>, %22, %cst_13 [2] : vector<1x4x128xf32> to vector<1x4xf32>
    %24 = vector.shape_cast %23 : vector<1x4xf32> to vector<1x4x1xf32>
    %25 = vector.broadcast %9 : vector<1x1x1xf32> to vector<1x4x1xf32>
    %26 = arith.mulf %21, %25 : vector<1x4x1xf32>
    %27 = arith.mulf %26, %21 : vector<1x4x1xf32>
    %28 = arith.subf %24, %27 : vector<1x4x1xf32>
    %29 = vector.broadcast %17 : vector<1x1x1xf32> to vector<1x4x1xf32>
    %30 = arith.mulf %28, %29 : vector<1x4x1xf32>
    %cst_14 = arith.constant 0.000000e+00 : f32
    %31 = vector.broadcast %cst_14 : f32 to vector<1x4x1xf32>
    %32 = arith.maximumf %30, %31 : vector<1x4x1xf32>
    %cst_15 = arith.constant 9.99999993E-9 : f32
    %33 = vector.broadcast %cst_15 : f32 to vector<1x4x1xf32>
    %34 = arith.addf %32, %33 : vector<1x4x1xf32>
    %35 = math.rsqrt %34 : vector<1x4x1xf32>
    %c0_16 = arith.constant 0 : index
    %c0_17 = arith.constant 0 : index
    %c0_18 = arith.constant 0 : index
    %36 = vector.load %arg4[%c0_16, %c0_17, %c0_18] : memref<1x4x1xf32, #tpu.memory_space<vmem>>, vector<1x4x1xf32>
    %37 = arith.mulf %36, %35 : vector<1x4x1xf32>
    %c0_19 = arith.constant 0 : index
    %c0_20 = arith.constant 0 : index
    %c0_21 = arith.constant 0 : index
    %38 = vector.load %arg5[%c0_19, %c0_20, %c0_21] : memref<1x4x1xf32, #tpu.memory_space<vmem>>, vector<1x4x1xf32>
    %39 = arith.mulf %26, %37 : vector<1x4x1xf32>
    %40 = arith.subf %38, %39 : vector<1x4x1xf32>
    %41 = vector.broadcast %37 : vector<1x4x1xf32> to vector<1x4x128xf32>
    %42 = arith.mulf %0, %41 : vector<1x4x128xf32>
    %43 = vector.broadcast %40 : vector<1x4x1xf32> to vector<1x4x128xf32>
    %44 = arith.addf %42, %43 : vector<1x4x128xf32>
    %c0_22 = arith.constant 0 : index
    %c0_23 = arith.constant 0 : index
    %c0_24 = arith.constant 0 : index
    %45 = vector.load %arg6[%c0_22, %c0_23, %c0_24] : memref<1x4x128xf32, #tpu.memory_space<vmem>>, vector<1x4x128xf32>
    tpu.vector_store %arg6[%c0_22, %c0_23, %c0_24], %44 {strides = array<i32>} : memref<1x4x128xf32, #tpu.memory_space<vmem>>, vector<1x4x128xf32>,
    return
  }
  func.func @transform_0(%arg0: i32, %arg1: i32) -> (i32, i32, i32) {
    %c0_i32 = arith.constant 0 : i32
    %c0_i32_0 = arith.constant 0 : i32
    return %arg0, %arg1, %c0_i32 : i32, i32, i32
  }
  func.func @transform_1(%arg0: i32, %arg1: i32) -> (i32, i32, i32) {
    %c0_i32 = arith.constant 0 : i32
    %c0_i32_0 = arith.constant 0 : i32
    %c0_i32_1 = arith.constant 0 : i32
    return %arg0, %c0_i32, %c0_i32_0 : i32, i32, i32
  }
  func.func @transform_2(%arg0: i32, %arg1: i32) -> (i32, i32, i32) {
    %c0_i32 = arith.constant 0 : i32
    %c0_i32_0 = arith.constant 0 : i32
    %c0_i32_1 = arith.constant 0 : i32
    return %c0_i32, %arg1, %c0_i32_0 : i32, i32, i32
  }
  func.func @transform_3(%arg0: i32, %arg1: i32) -> (i32, i32, i32) {
    %c0_i32 = arith.constant 0 : i32
    %c0_i32_0 = arith.constant 0 : i32
    %c0_i32_1 = arith.constant 0 : i32
    return %c0_i32, %arg1, %c0_i32_0 : i32, i32, i32
  }
  func.func @transform_4(%arg0: i32, %arg1: i32) -> (i32, i32, i32) {
    %c0_i32 = arith.constant 0 : i32
    %c0_i32_0 = arith.constant 0 : i32
    return %arg0, %arg1, %c0_i32 : i32, i32, i32
  }
}

</mosaic_0001>

<bundles_post_ra>
// kernel: tpu_custom_call.1
= control target key start
LH: loop header
LB: loop body
LE: loop exit
PB: predicated region body
PF: predicated region fallthrough
CT: control target
= control target key end

     0   :  { %9 = vsyncpa [#allocation3], 0  ;;  %s878_s0 = inlined_call_operand.vmem [shape: f32[2,4,128], index: 0, kind: input, shape index: {}]   ;;  %s879_s1 = inlined_call_operand.hbm [shape: f32[2,1,128], index: 1, kind: input, shape index: {}]   ;;  %s880_s2 = inlined_call_operand.vmem [shape: f32[1,4,1], index: 2, kind: input, shape index: {}]   ;;  %s881_s3 = inlined_call_operand.vmem [shape: f32[1,4,1], index: 3, kind: input, shape index: {}]   ;;  %s882_s4 = inlined_call_operand.hbm [shape: f32[2,4,128], index: 4, kind: output, shape index: {}]  }
   0x1   :  { %11 = vsyncpa [#allocation3 + $0x1], 0 }
   0x2   :  { %12 = vsyncpa [#allocation4], 0 }
   0x3   :  { %14 = vsyncpa [#allocation4 + $0x1], 0  ;;  %s740_s15 = smov 0   ;;  %s742_s16 = smov 0  }
   0x4   :  { %s744_s17 = smov 0   ;;  %s746_s18 = smov 0  }
   0x5   :  { %s748_s19 = smov 0   ;;  %s750_s20 = smov 0  }
   0x6 LB: > { %s513_s21 = sadd.s32 4294967295, %s712_s20   ;;  %s514_s22 = sadd.s32 4294967294, %s712_s20   ;;  %s712_s20 = sphi %s750_s20, %s20_s20   ;;  %s708_s19 = sphi %s748_s19, %s891_s19   ;;  %s704_s18 = sphi %s746_s18, %s890_s18   ;;  %s700_s17 = sphi %s744_s17, %s889_s17   ;;  %s696_s16 = sphi %s742_s16, %s888_s16   ;;  %s692_s15 = sphi %s740_s15, %s887_s15  }
   0x7   : > { %s32_s23 = sadd.s32 1, %s708_s19  ;;  %s67_s24 = sadd.s32 1, %s700_s17 }
   0x8   : > { %p34_p0 = scmp.ge.s32.totalorder %s32_s23, 2  ;;  %p74_p1 = scmp.ne.s32.totalorder %s700_s17, %s696_s16 }
   0x9   : > { %p75_p2 = scmp.eq.s32.totalorder %s712_s20, 0  ;;  %p80_p3 = scmp.ne.s32.totalorder %s696_s16, %s692_s15 }
   0xa   : > { %s893_s23 = smov (%p34_p0, %s32_s23), 0  ;;  %p81_p5 = scmp.eq.s32.totalorder %s513_s21, 0 }
   0xb   : > { %p781_p4 = por %p75_p2, %p74_p1  ;;  %s64_s26 = ssub.s32 %s708_s19, %s893_s23 }
   0xc   : > { %p158_p6 = scmp.eq.s32.totalorder %s513_s21, 1  ;;  %p65_p7 = scmp.eq.s32.totalorder %s64_s26, 0 }
   0xd   : > { %p787_p8 = por %p81_p5, %p80_p3  ;;  %p164_p10 = scmp.eq.s32.totalorder %s514_s22, 1 }
   0xe   : > { %p791_p9 = por %p158_p6, %p74_p1  ;;  %p518_p12 = scmp.ge.s32.totalorder %s712_s20, 2 }
   0xf   : > { %s796_s29 = scalar_select %p65_p7, %s700_s17, %s67_s24  }
  0x10   : > { %p798_p11 = por %p164_p10, %p80_p3  ;;  %p539_p13 = scmp.lt.s32.totalorder %s712_s20, 2 }
  0x11   : > { %s208_s5 = sand.u32 1, %s700_s17   ;;  %s214_s8 = scalar_lea.hbm %s879_s1, %s708_s19 }
  0x12   : > { %s211_s9 = scalar_lea.vmem [#allocation2], %s208_s5  ;;  %s216_s11 = sshll.u32 %s214_s8, 4  ;;  %s217_s11 = int_to_ptr.hbm [resolvable:$true] %s216_s11 }
  0x13   : > { %s218_s10 = sshll.u32 %s211_s9, 4  ;;  %p532_p0 = pnand %p539_p13, %p781_p4  ;;  %s219_s10 = int_to_ptr.vmem [resolvable:$true] %s218_s10 }
  0x14   : > { %p519_p1 = scmp.ge.s32.totalorder %s712_s20, 1  ;;  %p223_p2 = scmp.lt.s32.totalorder %s712_s20, 3 }
  0x15   : > { %s209_s12 = scalar_lea.sflag [#allocation3], %s208_s5 }
  0x16   : > { %534 = dma.hbm_to_vmem [thread:$0]  (!%p532_p0), %s217_s11, 16, %s219_s10, %s209_s12  }
  0x17   : > { %p224_p3 = pnand %p519_p1, %p223_p2 }
  0x18   : > { %s814_s13 = sand.u32 (!%p224_p3), 1, %s696_s16  }
  0x19   : > { %227 = sbr.rel (%p224_p3) target bundleno = 326 (0x146), region = 36  ;;  %s230_s14 = scalar_lea.sflag (!%p224_p3), [#allocation3], %s814_s13 }
  0x1a   : > { %s232_s21 = scalar_lea.vmem (!%p224_p3), [#allocation2], %s814_s13 }
  0x1e   : > { %683 = dma.done.wait (%p787_p8), %s230_s14, 16  }
  0x1f   : > { %685 = vsyncadd (%p787_p8), %s230_s14, 4294967280  ;;  %p272_p4 = scmp.lt.s32.totalorder %s704_s18, 1  ;;  %vm289_vm0 = vcmask 1040384   ;;  %v288_v0 = vld [vmem:[%s232_s21] sm:$0x1]  ;;  %vm332_vm1 = vcmask 1043456  }
  0x20   : > { %v593_v1 = vld [vmem:[%s232_s21] ss:$0 sm:$0xff]  ;;  %v290_v3 = vsel %vm289_vm0, %v288_v0, 0.0  ;;  %v714_v25 = vmov 0   ;;  %s520_s9 = sshll.u32 %s814_s13, 2  ;;  %s524_s10 = sshll.u32 %s704_s18, 2 }
  0x21   : > { %s273_s22 = scalar_select %p272_p4, %s704_s18, 1  ;;  %291 = vadd.xlane.f32.xlu0 %v290_v3  ;;  %590 = vset.pattern.permute.xlu1 %v714_v25  ;;  %v358_v51 = vld [vmem:[%s880_s2] sm:$0xf] }
  0x22   : > { %591 = vset.pattern.permute.xlu2 %v714_v25  ;;  %592 = vset.pattern.permute.xlu0 %v714_v25  ;;  %v360_v54 = vld [vmem:[%s881_s3] sm:$0xf]  ;;  %s388_s14 = scalar_lea.hbm %s882_s4, %s524_s10  ;;  %s271_s21 = scalar_lea.vmem [#allocation5], %s520_s9 }
  0x23   : > { %s521_s24 = sshll.u32 %s273_s22, 2  ;;  %s390_s22 = sshll.u32 %s271_s21, 4  ;;  %s391_s22 = int_to_ptr.vmem [resolvable:$true] %s390_s22 }
  0x24   : > { %s278_s5 = scalar_lea.vmem %s878_s0, %s521_s24  ;;  %s392_s24 = sshll.u32 %s388_s14, 4  ;;  %s393_s24 = int_to_ptr.hbm [resolvable:$true] %s392_s24 }
  0x25   : > { %v827_v2 = vld [vmem:[%s278_s5] sm:$0xf]  ;;  %s377_s25 = scalar_lea.sflag [#allocation4], %s814_s13  ;;  %s644_s26 = sshra.s32 %s393_s24, 4  ;;  %s645_s26 = int_to_ptr.hbm [resolvable:$true] %s644_s26 }
  0x26   : > { %v331_v4 = vmul.f32 %v593_v1, %v827_v2  ;;  %s646_s18 = scalar_lea.hbm %s645_s26, 4  ;;  %s650_s6 = scalar_lea.hbm %s882_s4, 8 }
  0x27   : > { %p647_p5 = scmp.ne.s32.totalorder %s645_s26, %s646_s18  ;;  %p651_p8 = scmp.lt.s32.totalorder %s645_s26, %s882_s4 }
  0x28   : > { %v336_v5 = vmul.f32 %v331_v4, %v827_v2  ;;  %v333_v7 = vsel %vm332_vm1, %v331_v4, 0.0  ;;  %p652_p10 = scmp.lt.s32.totalorder %s650_s6, %s646_s18 }
  0x29   : > { %334 = vadd.xlane.f32.xlu0 %v333_v7  ;;  %p648_p6 = pnand %p647_p5, %p791_p9 }
  0x2a   : > { %v337_v6 = vsel %vm332_vm1, %v336_v5, 0.0  ;;  %p653_p13 = por %p652_p10, %p651_p8 }
  0x2b   : > { %338 = vadd.xlane.f32.xlu1 %v337_v6  ;;  %p649_p7 = pneg %p648_p6 }
  0x2d   : > { %p654_p0 = pnand %p653_p13, %p649_p7 }
  0x94   : > { %v292_v8 = vpop.xlane.xlu0 %291 }
  0x95   : > { %v293_v9 = vmax.f32 %v292_v8, 1.0  ;;  %v522_v10 = vadd.f32 -1.0, %v292_v8 }
  0x97   : > { %v294_v11 = vmin.f32 %v293_v9, 100000.0  ;;  %v311_v12 = vmax.f32 %v522_v10, 1.0 }
  0x99   : > { %594 = vrcp.f32 %v294_v11  ;;  %v312_v13 = vmin.f32 %v311_v12, 100000.0  ;;  %v304_v19 = vand.u32 2147483647, %v294_v11  ;;  %v306_v20 = vand.u32 2147483648, %v294_v11 }
  0x9a   : > { %vm300_vm3 = vweird.f32 %v294_v11 }
  0x9b   : > { %596 = vrcp.f32 %v312_v13  ;;  %vm305_vm6 = vcmp.eq.f32.partialorder %v304_v19, 8.507059e+37  ;;  %v307_v26 = vor.u32 1.1754944e-38, %v306_v20  ;;  %v324_v27 = vand.u32 2147483648, %v312_v13 }
  0x9c   : > { %vm318_vm7 = vweird.f32 %v312_v13  ;;  %v322_v30 = vand.u32 2147483647, %v312_v13  ;;  %v335_v32 = vpop.xlane.xlu0 %334 }
  0x9d   : > { %v325_v35 = vor.u32 1.1754944e-38, %v324_v27 }
  0x9e   : > { %vm323_vm9 = vcmp.eq.f32.partialorder %v322_v30, 8.507059e+37  ;;  %v339_v38 = vpop.xlane.xlu1 %338 }
  0x9f   : > { %v595_v14 = vpop.eup %594 }
  0xa0   : > { %v296_v15 = vmul.f32 %v595_v14, %v294_v11  ;;  %vm301_vm2 = vweird.f32 %v595_v14 }
  0xa1   : > { %v597_v16 = vpop.eup %596  ;;  %vm302_vm5 = vmor %vm300_vm3, %vm301_vm2 }
  0xa2   : > { %v314_v17 = vmul.f32 %v597_v16, %v312_v13  ;;  %v297_v18 = vsub.f32 1.0, %v296_v15  ;;  %vm319_vm4 = vweird.f32 %v597_v16 }
  0xa3   : > { %vm320_vm8 = vmor %vm318_vm7, %vm319_vm4 }
  0xa4   : > { %v298_v21 = vmul.f32 %v595_v14, %v297_v18  ;;  %v315_v22 = vsub.f32 1.0, %v314_v17 }
  0xa6   : > { %v299_v23 = vadd.f32 %v595_v14, %v298_v21  ;;  %v316_v24 = vmul.f32 %v597_v16, %v315_v22 }
  0xa8   : > { %v303_v28 = vsel %vm302_vm5, %v595_v14, %v299_v23  ;;  %v317_v29 = vadd.f32 %v597_v16, %v316_v24 }
  0xa9   : > { %v308_v31 = vsel %vm305_vm6, %v307_v26, %v303_v28 }
  0xaa   : > { %v340_v33 = vperm.slane %v308_v31, 0  ;;  %v321_v34 = vsel %vm320_vm8, %v597_v16, %v317_v29 }
  0xab   : > { %v326_v37 = vsel %vm323_vm9, %v325_v35, %v321_v34 }
  0xac   : > { %v341_v36 = vmul.f32 %v340_v33, %v335_v32  ;;  %v344_v40 = vperm.slane %v326_v37, 0 }
  0xae   : > { %v342_v39 = vmul.f32 %v341_v36, %v335_v32 }
  0xb0   : > { %v343_v41 = vsub.f32 %v339_v38, %v342_v39 }
  0xb2   : > { %v345_v42 = vmul.f32 %v344_v40, %v343_v41 }
  0xb4   : > { %v346_v43 = vmax.f32 %v345_v42, 0.0 }
  0xb6   : > { %v347_v44 = vadd.f32 1e-08, %v346_v43 }
  0xb8   : > { %598 = vrsqrt.f32 %v347_v44  ;;  %vm354_vm11 = vweird.f32 %v347_v44 }
  0xbe   : > { %v599_v45 = vpop.eup %598 }
  0xbf   : > { %v349_v46 = vmul.f32 %v599_v45, %v347_v44  ;;  %vm355_vm10 = vweird.f32 %v599_v45 }
  0xc0   : > { %vm356_vm12 = vmor %vm354_vm11, %vm355_vm10 }
  0xc1   : > { %v350_v47 = vmul.f32 %v599_v45, %v349_v46 }
  0xc3   : > { %v351_v48 = vmul.f32 0.5, %v350_v47 }
  0xc5   : > { %v352_v49 = vsub.f32 1.5, %v351_v48 }
  0xc7   : > { %v353_v50 = vmul.f32 %v599_v45, %v352_v49 }
  0xc9   : > { %v357_v52 = vsel %vm356_vm12, %v599_v45, %v353_v50 }
  0xca   : > { %v359_v53 = vmul.f32 %v358_v51, %v357_v52 }
  0xcc   : > { %365 = vperm.xlu1 %590, %v359_v53   ;;  %v361_v55 = vmul.f32 %v359_v53, %v341_v36 }
  0xce   : > { %v362_v56 = vsub.f32 %v360_v54, %v361_v55 }
  0xd0   : > { %371 = vperm.xlu2 %591, %v362_v56  }
 0x12a   : > { %v372_v59 = vpop.permute.xlu2 %371 }
 0x13e   : > { %v366_v57 = vpop.permute.xlu1 %365 }
 0x13f   : > { %v368_v58 = vmul.f32 %v366_v57, %v827_v2 }
 0x141   : > { %v374_v60 = vadd.f32 %v372_v59, %v368_v58 }
 0x143   : > { %375 = vst [vmem:[%s271_s21] sm:$0xf] %v374_v60 }
 0x144   : > { %657 = shalt.err (!%p654_p0)
}
 0x145   : > { %529 = dma.vmem_to_hbm [thread:$0]  (%p791_p9), %s391_s22, 64, %s393_s24, %s377_s25  }
 0x146 PF: > { %s404_s13 = sand.u32 1, %s692_s15   ;;  %p536_p1 = pnand %p518_p12, %p798_p11 }
 0x147   : > { %s405_s9 = scalar_lea.sflag [#allocation4], %s404_s13 }
 0x148   : > { %p537_p2 = pneg %p536_p1 }
 0x14a   : > { %687 = dma.done.wait (%p537_p2), %s405_s9, 64  }
 0x14b   : > { %689 = vsyncadd (%p537_p2), %s405_s9, 4294967232  ;;  %s20_s20 = sadd.s32 1, %s712_s20   ;;  %s887_s15 = smov %s696_s16 }
 0x14c   : > { %p17_p3 = scmp.ge.s32.totalorder %s20_s20, 4   ;;  %s888_s16 = smov %s700_s17 }
 0x14d   : > { %s889_s17 = smov %s796_s29  ;;  %s890_s18 = smov %s708_s19 }
 0x14e   : > { %s891_s19 = smov %s893_s23  ;;  %19 = sbr.rel (!%p17_p3) target bundleno = 6 (0x6), region = 90 }
 0x153   :  { %411 = vsyncpa [#allocation3], 1 }
 0x154   :  { %413 = vsyncpa [#allocation3 + $0x1], 1 }
 0x155   :  { %414 = vsyncpa [#allocation4], 1 }
 0x156   :  { %416 = vsyncpa [#allocation4 + $0x1], 1 }

</bundles_post_ra>
